<compile_context>
chip_gen: v7x
topology: tpu7x:2x2x1
jax: 0.10.0
libtpu: 0.0.40
codegen_flags: <defaults>
</compile_context>

<pallas_src>
import functools

import jax
import jax.numpy as jnp
from jax.experimental import pallas as pl
from jax.experimental.pallas import tpu as pltpu

EPS = 1e-5


def _round_up(x, m):
    return ((x + m - 1) // m) * m


def _groupnorm1_kernel(x_ref, gamma_ref, beta_ref, o_ref, *,
                       inv_count, elementwise_dtype):
    # x_ref:     (B_tile, C_eff, HW_eff) block; last two dims == full array
    #            dims, so no HBM padding and Mosaic handles vreg padding.
    # gamma_ref: (C_eff, 1) per-channel scale (f32)
    # beta_ref:  (C_eff, 1) per-channel shift (f32)
    x = x_ref[...]                                         # input dtype

    # ---- statistics: exact two-pass over the resident block, f32 accum ----
    xs = x.astype(jnp.float32)
    mean = jnp.sum(xs, axis=(1, 2), keepdims=True) * inv_count     # (B,1,1)
    xc = xs - mean
    var = jnp.sum(xc * xc, axis=(1, 2), keepdims=True) * inv_count
    inv_std = jax.lax.rsqrt(var + EPS)                             # (B,1,1)

    # ---- fold normalization + affine into per-(sample,channel) scale/shift
    gamma = gamma_ref[...][None, :, :]                     # (1, C, 1) f32
    beta = beta_ref[...][None, :, :]
    scale = gamma * inv_std                                # (B, C, 1)
    shift = beta - mean * scale                            # (B, C, 1)

    # ---- elementwise normalize: 2 VPU ops / element in elementwise_dtype
    # (bf16 for bf16 I/O on bf16-VPU chips; f32 otherwise).
    cdt = elementwise_dtype
    o_ref[...] = (x.astype(cdt) * scale.astype(cdt)
                  + shift.astype(cdt)).astype(o_ref.dtype)


def _largest_divisor_leq(n, cap):
    cap = max(1, min(n, cap))
    for d in range(cap, 0, -1):
        if n % d == 0:
            return d
    return 1


def _choose_fold(c, hw, sub_pack):
    """Pick k | hw minimizing the padded-vreg footprint of a (C*k, HW/k) tile."""
    best_k, best_key = 1, None
    for k in range(1, hw + 1):
        if hw % k:
            continue
        c_eff, hw_eff = c * k, hw // k
        footprint = _round_up(c_eff, sub_pack) * _round_up(hw_eff, 128)
        key = (footprint, k)
        if best_key is None or key < best_key:
            best_key, best_k = key, k
    return best_k


def _vmem_capacity_bytes():
    try:
        return int(pltpu.get_tpu_info().vmem_capacity_bytes)
    except Exception:
        return 64 << 20  # conservative fallback: v7x per-TensorCore VMEM


def groupnorm1(x_nchw, gamma, beta):
    """GroupNorm(num_groups=1, num_channels=C) on an NCHW tensor via Pallas."""
    n, c, h, w = x_nchw.shape
    hw = h * w
    dtype = x_nchw.dtype
    itemsize = jnp.dtype(dtype).itemsize
    sub_pack = 32 // itemsize                 # sublane packing: 8 f32 / 16 bf16

    # Sublane fold (free contiguous reshape); stats over (C, HW) are unchanged.
    k = _choose_fold(c, hw, sub_pack)
    c_eff, hw_eff = c * k, hw // k
    x3 = x_nchw.reshape(n, c_eff, hw_eff)
    gamma2 = jnp.repeat(gamma.astype(jnp.float32), k).reshape(c_eff, 1)
    beta2 = jnp.repeat(beta.astype(jnp.float32), k).reshape(c_eff, 1)

    # Generation-aware block sizing.
    vmem_cap = _vmem_capacity_bytes()
    budget = int(0.6 * vmem_cap)
    per_sample_vmem_elems = _round_up(c_eff, sub_pack) * _round_up(hw_eff, 128)
    # 2x(in) + 2x(out) double-buffered tiles in the input dtype plus ~2 f32
    # block-sized stats temporaries.
    per_elem_bytes = 4 * itemsize + 8
    max_b_vmem = max(1, budget // max(per_sample_vmem_elems * per_elem_bytes, 1))
    # Keep >= min(n, 4) grid steps so both v7x TensorCores + pipelining stay busy.
    max_b_grid = max(1, n // min(n, 4))
    b_tile = _largest_divisor_leq(n, min(max_b_vmem, max_b_grid))

    vmem_need = b_tile * per_sample_vmem_elems * per_elem_bytes + (2 << 20)
    compiler_kwargs = dict(dimension_semantics=("parallel",))
    if vmem_need > (16 << 20):
        compiler_kwargs["vmem_limit_bytes"] = int(
            min(vmem_need * 1.25, 0.85 * vmem_cap))
    # TODO(synk): for single samples too large for ~60% of VMEM, tile the HW
    # axis with a stats-accumulation pass + normalize pass instead of
    # whole-sample blocks.

    elementwise_dtype = jnp.bfloat16 if dtype == jnp.bfloat16 else jnp.float32
    inv_count = 1.0 / float(c * hw)
    kernel = functools.partial(_groupnorm1_kernel, inv_count=inv_count,
                               elementwise_dtype=elementwise_dtype)

    cost = pl.CostEstimate(
        flops=8 * n * c * hw,
        transcendentals=n,
        bytes_accessed=2 * n * c * hw * itemsize + 2 * c_eff * 4,
    )

    out = pl.pallas_call(
        kernel,
        out_shape=jax.ShapeDtypeStruct((n, c_eff, hw_eff), dtype),
        grid_spec=pltpu.PrefetchScalarGridSpec(
            num_scalar_prefetch=0,
            grid=(n // b_tile,),
            in_specs=[
                pl.BlockSpec((b_tile, c_eff, hw_eff), lambda i: (i, 0, 0)),  # x
                pl.BlockSpec((c_eff, 1), lambda i: (0, 0)),                  # gamma
                pl.BlockSpec((c_eff, 1), lambda i: (0, 0)),                  # beta
            ],
            out_specs=pl.BlockSpec((b_tile, c_eff, hw_eff), lambda i: (i, 0, 0)),
        ),
        compiler_params=pltpu.CompilerParams(**compiler_kwargs),
        cost_estimate=cost,
    )(x3, gamma2, beta2)

    return out.reshape(n, c, h, w)


class PreNorm:
    """JAX/Pallas port of the PyTorch PreNorm module."""

    def __init__(self, dim, fn=None, *, key=None):
        # nn.GroupNorm default init: weight=1, bias=0.  Small deterministic
        # perturbations so the affine path is actually exercised.
        if key is None:
            key = jax.random.PRNGKey(0)
        kw, kb = jax.random.split(key)
        self.weight = 1.0 + 0.1 * jax.random.normal(kw, (dim,), dtype=jnp.float32)
        self.bias = 0.1 * jax.random.normal(kb, (dim,), dtype=jnp.float32)
        # fn is an arbitrary wrapped module; composed in plain JAX.
        self.fn = fn if fn is not None else (lambda y: y)

    def __call__(self, x):
        x = groupnorm1(x, self.weight, self.bias)
        return self.fn(x)


def _reference(x, gamma, beta):
    # Pure-JAX reference of GroupNorm(1, C).
    n, c, h, w = x.shape
    xf = x.reshape(n, -1).astype(jnp.float32)
    mean = xf.mean(axis=1, keepdims=True)
    var = ((xf - mean) ** 2).mean(axis=1, keepdims=True)
    xn = (xf - mean) / jnp.sqrt(var + EPS)
    xn = xn.reshape(n, c, h, w)
    return xn * gamma[None, :, None, None] + beta[None, :, None, None]


if __name__ == "__main__":
    key = jax.random.PRNGKey(0)
    kx, kp = jax.random.split(key)

    N, C, H, W = 2, 4, 16, 16
    x = jax.random.normal(kx, (N, C, H, W), dtype=jnp.float32)

    module = PreNorm(C, fn=None, key=kp)  # fn = identity (wrapped module is arbitrary)
    out = jax.block_until_ready(module(x))
    ref = _reference(x, module.weight, module.bias)
    assert out.shape == (N, C, H, W)
    assert jnp.allclose(out, ref, atol=1e-4, rtol=1e-4), "mismatch vs reference"

    # Non-multiple-of-128 spatial size: no wrapper-side pad/slice HBM passes.
    H2, W2 = 14, 14
    x2 = jax.random.normal(kx, (N, C, H2, W2), dtype=jnp.float32)
    out2 = jax.block_until_ready(groupnorm1(x2, module.weight, module.bias))
    ref2 = _reference(x2, module.weight, module.bias)
    assert jnp.allclose(out2, ref2, atol=1e-4, rtol=1e-4), "mismatch (unaligned HW)"

    # bf16 I/O path: stats stay f32, elementwise normalize runs in bf16.
    xb = jax.random.normal(kx, (N, C, H, W), dtype=jnp.float32).astype(jnp.bfloat16)
    outb = jax.block_until_ready(groupnorm1(xb, module.weight, module.bias))
    refb = _reference(xb.astype(jnp.float32), module.weight, module.bias)
    assert outb.dtype == jnp.bfloat16
    assert jnp.allclose(outb.astype(jnp.float32), refb, atol=1e-1, rtol=5e-2), \
        "mismatch (bf16)"

    print("KERNEL_OK")
</pallas_src>

<mosaic_0001>
module attributes {stable_mosaic.version = 11 : i64} {
  func.func @_groupnorm1_kernel(%arg0: i32, %arg1: memref<1x8x128xf32, #tpu.memory_space<vmem>>, %arg2: memref<8x1xf32, #tpu.memory_space<vmem>>, %arg3: memref<8x1xf32, #tpu.memory_space<vmem>>, %arg4: memref<1x8x128xf32, #tpu.memory_space<vmem>>) attributes {dimension_semantics = [#tpu.dimension_semantics<parallel>], iteration_bounds = array<i64: 2>, scalar_prefetch = 0 : i64, scratch_operands = 0 : i64, tpu.core_type = #tpu.core_type<tc>, window_params = [{transform_indices = @transform_0, window_bounds = array<i64: 1, 8, 128>}, {pipeline_mode = #tpu.pipeline_mode<synchronous>, transform_indices = @transform_1, window_bounds = array<i64: 8, 1>}, {pipeline_mode = #tpu.pipeline_mode<synchronous>, transform_indices = @transform_2, window_bounds = array<i64: 8, 1>}, {transform_indices = @transform_3, window_bounds = array<i64: 1, 8, 128>}]} {
    %c0 = arith.constant 0 : index
    %c0_0 = arith.constant 0 : index
    %c0_1 = arith.constant 0 : index
    %0 = vector.load %arg1[%c0, %c0_0, %c0_1] : memref<1x8x128xf32, #tpu.memory_space<vmem>>, vector<1x8x128xf32>
    %cst = arith.constant dense<0.000000e+00> : vector<1xf32>
    %1 = vector.multi_reduction <add>, %0, %cst [1, 2] : vector<1x8x128xf32> to vector<1xf32>
    %2 = vector.shape_cast %1 : vector<1xf32> to vector<1x1x1xf32>
    %cst_2 = arith.constant 9.765625E-4 : f32
    %3 = vector.broadcast %cst_2 : f32 to vector<1x1x1xf32>
    %4 = arith.mulf %2, %3 : vector<1x1x1xf32>
    %5 = vector.broadcast %4 : vector<1x1x1xf32> to vector<1x8x128xf32>
    %6 = arith.subf %0, %5 : vector<1x8x128xf32>
    %7 = arith.mulf %6, %6 : vector<1x8x128xf32>
    %cst_3 = arith.constant dense<0.000000e+00> : vector<1xf32>
    %8 = vector.multi_reduction <add>, %7, %cst_3 [1, 2] : vector<1x8x128xf32> to vector<1xf32>
    %9 = vector.shape_cast %8 : vector<1xf32> to vector<1x1x1xf32>
    %cst_4 = arith.constant 9.765625E-4 : f32
    %10 = vector.broadcast %cst_4 : f32 to vector<1x1x1xf32>
    %11 = arith.mulf %9, %10 : vector<1x1x1xf32>
    %cst_5 = arith.constant 9.99999974E-6 : f32
    %12 = vector.broadcast %cst_5 : f32 to vector<1x1x1xf32>
    %13 = arith.addf %11, %12 : vector<1x1x1xf32>
    %14 = math.rsqrt %13 : vector<1x1x1xf32>
    %c0_6 = arith.constant 0 : index
    %c0_7 = arith.constant 0 : index
    %15 = vector.load %arg2[%c0_6, %c0_7] : memref<8x1xf32, #tpu.memory_space<vmem>>, vector<8x1xf32>
    %16 = vector.shape_cast %15 : vector<8x1xf32> to vector<1x8x1xf32>
    %c0_8 = arith.constant 0 : index
    %c0_9 = arith.constant 0 : index
    %17 = vector.load %arg3[%c0_8, %c0_9] : memref<8x1xf32, #tpu.memory_space<vmem>>, vector<8x1xf32>
    %18 = vector.shape_cast %17 : vector<8x1xf32> to vector<1x8x1xf32>
    %19 = vector.broadcast %14 : vector<1x1x1xf32> to vector<1x8x1xf32>
    %20 = arith.mulf %16, %19 : vector<1x8x1xf32>
    %21 = vector.broadcast %4 : vector<1x1x1xf32> to vector<1x8x1xf32>
    %22 = arith.mulf %21, %20 : vector<1x8x1xf32>
    %23 = arith.subf %18, %22 : vector<1x8x1xf32>
    %24 = vector.broadcast %20 : vector<1x8x1xf32> to vector<1x8x128xf32>
    %25 = arith.mulf %0, %24 : vector<1x8x128xf32>
    %26 = vector.broadcast %23 : vector<1x8x1xf32> to vector<1x8x128xf32>
    %27 = arith.addf %25, %26 : vector<1x8x128xf32>
    %c0_10 = arith.constant 0 : index
    %c0_11 = arith.constant 0 : index
    %c0_12 = arith.constant 0 : index
    %28 = vector.load %arg4[%c0_10, %c0_11, %c0_12] : memref<1x8x128xf32, #tpu.memory_space<vmem>>, vector<1x8x128xf32>
    tpu.vector_store %arg4[%c0_10, %c0_11, %c0_12], %27 {strides = array<i32>} : memref<1x8x128xf32, #tpu.memory_space<vmem>>, vector<1x8x128xf32>,
    return
  }
  func.func @transform_0(%arg0: i32) -> (i32, i32, i32) {
    %c0_i32 = arith.constant 0 : i32
    %c0_i32_0 = arith.constant 0 : i32
    %c0_i32_1 = arith.constant 0 : i32
    return %arg0, %c0_i32, %c0_i32_0 : i32, i32, i32
  }
  func.func @transform_1(%arg0: i32) -> (i32, i32) {
    %c0_i32 = arith.constant 0 : i32
    %c0_i32_0 = arith.constant 0 : i32
    %c0_i32_1 = arith.constant 0 : i32
    return %c0_i32, %c0_i32_0 : i32, i32
  }
  func.func @transform_2(%arg0: i32) -> (i32, i32) {
    %c0_i32 = arith.constant 0 : i32
    %c0_i32_0 = arith.constant 0 : i32
    %c0_i32_1 = arith.constant 0 : i32
    return %c0_i32, %c0_i32_0 : i32, i32
  }
  func.func @transform_3(%arg0: i32) -> (i32, i32, i32) {
    %c0_i32 = arith.constant 0 : i32
    %c0_i32_0 = arith.constant 0 : i32
    %c0_i32_1 = arith.constant 0 : i32
    return %arg0, %c0_i32, %c0_i32_0 : i32, i32, i32
  }
}

</mosaic_0001>

<bundles_post_ra>
// kernel: tpu_custom_call.1
= control target key start
LH: loop header
LB: loop body
LE: loop exit
PB: predicated region body
PF: predicated region fallthrough
CT: control target
= control target key end

     0   :  { %8 = vsyncpa [#allocation3], 0  ;;  %s526_s0 = inlined_call_operand.vmem [shape: f32[2,8,128], index: 0, kind: input, shape index: {}]   ;;  %s527_s1 = inlined_call_operand.vmem [shape: f32[8,1], index: 1, kind: input, shape index: {}]   ;;  %s528_s2 = inlined_call_operand.vmem [shape: f32[8,1], index: 2, kind: input, shape index: {}]   ;;  %s529_s3 = inlined_call_operand.hbm [shape: f32[2,8,128], index: 3, kind: output, shape index: {}]  }
   0x1   :  { %10 = vsyncpa [#allocation3 + $0x1], 0  ;;  %s420_s12 = smov 0   ;;  %s422_s13 = smov 0  }
   0x2   :  { %s424_s14 = smov 0   ;;  %s426_s15 = smov 0  }
   0x3 LB: > { %s441_s16 = sadd.s32 4294967295, %s396_s15   ;;  %s280_s17 = sadd.s32 4294967294, %s396_s15   ;;  %s396_s15 = sphi %s426_s15, %s535_s15   ;;  %s392_s14 = sphi %s424_s14, %s534_s14   ;;  %s388_s13 = sphi %s422_s13, %s533_s13   ;;  %s384_s12 = sphi %s420_s12, %s532_s12  }
   0x4   : > { %s445_s18 = sadd.s32 1, %s396_s15   ;;  %s91_s19 = sadd.s32 1, %s392_s14 }
   0x5   : > { %s88_s20 = ssub.s32 %s396_s15, %s445_s18  ;;  %p101_p0 = scmp.ne.s32.totalorder %s392_s14, %s388_s13 }
   0x6   : > { %p89_p1 = scmp.eq.s32.totalorder %s88_s20, 0  ;;  %p102_p2 = scmp.eq.s32.totalorder %s441_s16, 1 }
   0x7   : > { %p107_p3 = scmp.ne.s32.totalorder %s388_s13, %s384_s12  ;;  %p108_p4 = scmp.eq.s32.totalorder %s280_s17, 1 }
   0x8   : > { %s456_s21 = scalar_select %p89_p1, %s392_s14, %s91_s19  }
   0x9   : > { %p458_p5 = por %p102_p2, %p101_p0  ;;  %p462_p6 = por %p108_p4, %p107_p3 }
   0xa   : > { %p283_p7 = scmp.ge.s32.totalorder %s396_s15, 1  ;;  %p139_p8 = scmp.lt.s32.totalorder %s396_s15, 3 }
   0xc   : > { %p140_p9 = pnand %p283_p7, %p139_p8 }
   0xd   : > { %p162_p10 = scmp.lt.s32.totalorder (!%p140_p9), %s441_s16, 1  ;;  %v398_v11 = vmov (!%p140_p9), 0   ;;  %v189_v21 = vld [vmem:[%s527_s1] sm:$0xff] (!%p140_p9)  ;;  %s159_s6 = sand.u32 (!%p140_p9), 1, %s388_s13  }
   0xe   : > { %143 = sbr.rel (%p140_p9) target bundleno = 505 (0x1f9), region = 32  ;;  %330 = vset.pattern.permute.xlu1 (!%p140_p9), %v398_v11  ;;  %331 = vset.pattern.permute.xlu0 (!%p140_p9), %v398_v11  ;;  %v190_v24 = vld [vmem:[%s528_s2] sm:$0xff] (!%p140_p9)  ;;  %s284_s7 = sshll.u32 (!%p140_p9), %s159_s6, 3 }
   0xf   : > { %s287_s8 = sshll.u32 (!%p140_p9), %s441_s16, 7  ;;  %s161_s9 = scalar_lea.vmem (!%p140_p9), [#allocation2], %s284_s7 }
  0x10   : > { %s221_s10 = sshll.u32 (!%p140_p9), %s161_s9, 4  ;;  %s484_s19 = scalar_lea.hbm (!%p140_p9), %s529_s3, %s287_s8  ;;  %s486_s10 = int_to_ptr.vmem [resolvable:$true] %s221_s10 }
  0x11   : > { %s208_s20 = scalar_lea.sflag (!%p140_p9), [#allocation3], %s159_s6 }
  0x15   : > { %s163_s24 = scalar_select %p162_p10, %s441_s16, 1 }
  0x16   : > { %s399_s16 = smov [#allocation2]  }
  0x17   : > { %s285_s25 = sshll.u32 %s163_s24, 3  ;;  %s334_s24 = scalar_lea.vmem %s486_s10, 128 }
  0x18   : > { %s165_s28 = scalar_lea.vmem %s526_s0, %s285_s25  ;;  %p335_p11 = scmp.ne.s32.totalorder %s486_s10, %s334_s24 }
  0x19   : > { %v166_v0 = vld [vmem:[%s165_s28] sm:$0xff]  ;;  %s338_s25 = sshll.u32 %s399_s16, 4  ;;  %s339_s25 = int_to_ptr.vmem [resolvable:$false] %s338_s25 }
  0x1a   : > { %167 = vadd.xlane.f32.xlu0 %v166_v0  ;;  %p336_p12 = pnand %p335_p11, %p458_p5  ;;  %s340_s26 = scalar_lea.vmem %s339_s25, 256 }
  0x1b   : > { %p341_p0 = scmp.lt.s32.totalorder %s486_s10, %s339_s25  ;;  %p342_p1 = scmp.lt.s32.totalorder %s340_s26, %s334_s24 }
  0x1c   : > { %p337_p13 = pneg %p336_p12 }
  0x1d   : > { %p343_p2 = por %p342_p1, %p341_p0 }
  0x1f   : > { %p344_p3 = pnand %p343_p2, %p337_p13 }
  0xa7   : > { %v168_v1 = vpop.xlane.xlu0 %167 }
  0xa8   : > { %v169_v2 = vrot.slane %v168_v1, 4 }
  0xaa   : > { %v170_v3 = vadd.f32 %v169_v2, %v168_v1 }
  0xac   : > { %v171_v4 = vrot.slane %v170_v3, 2 }
  0xae   : > { %v172_v5 = vadd.f32 %v171_v4, %v170_v3 }
  0xb0   : > { %v173_v6 = vrot.slane %v172_v5, 1 }
  0xb2   : > { %v174_v7 = vadd.f32 %v173_v6, %v172_v5 }
  0xb4   : > { %v175_v8 = vmul.f32 0.0009765625, %v174_v7 }
  0xb6   : > { %v176_v9 = vsub.f32 %v166_v0, %v175_v8 }
  0xb8   : > { %v177_v10 = vmul.f32 %v176_v9, %v176_v9 }
  0xba   : > { %178 = vadd.xlane.f32.xlu0 %v177_v10 }
 0x147   : > { %v179_v12 = vpop.xlane.xlu0 %178 }
 0x148   : > { %v180_v13 = vrot.slane %v179_v12, 4 }
 0x14a   : > { %v181_v14 = vadd.f32 %v180_v13, %v179_v12 }
 0x14c   : > { %v182_v15 = vrot.slane %v181_v14, 2 }
 0x14e   : > { %v183_v16 = vadd.f32 %v182_v15, %v181_v14 }
 0x150   : > { %v184_v17 = vrot.slane %v183_v16, 1 }
 0x152   : > { %v185_v18 = vadd.f32 %v184_v17, %v183_v16 }
 0x154   : > { %v186_v19 = vmul.f32 0.0009765625, %v185_v18 }
 0x156   : > { %v187_v20 = vadd.f32 1e-05, %v186_v19 }
 0x158   : > { %332 = vrsqrt.f32 %v187_v20 }
 0x162   : > { %v333_v22 = vpop.eup %332 }
 0x163   : > { %v191_v23 = vmul.f32 %v333_v22, %v189_v21 }
 0x165   : > { %196 = vperm.xlu1 %330, %v191_v23   ;;  %v192_v25 = vmul.f32 %v191_v23, %v175_v8 }
 0x167   : > { %v193_v26 = vsub.f32 %v190_v24, %v192_v25 }
 0x169   : > { %202 = vperm.xlu1 %330, %v193_v26  }
 0x1e4   : > { %v197_v27 = vpop.permute.xlu1 %196 }
 0x1e5   : > { %v199_v28 = vmul.f32 %v197_v27, %v166_v0 }
 0x1e8   : > { %v203_v29 = vpop.permute.xlu1 %202 }
 0x1e9   : > { %v205_v30 = vadd.f32 %v203_v29, %v199_v28 }
 0x1eb   : > { %206 = vst [vmem:[%s161_s9] sm:$0xff] %v205_v30 }
 0x1ec   : > { %347 = shalt.err (!%p344_p3)
}
 0x1ed   : > { %s348_s27 = scalar_lea.hbm %s484_s19, 128  ;;  %s352_s30 = scalar_lea.hbm %s529_s3, 256 }
 0x1ee   : > { %p349_p4 = scmp.ne.s32.totalorder %s484_s19, %s348_s27  ;;  %p353_p9 = scmp.lt.u32.totalorder %s484_s19, %s529_s3 }
 0x1ef   : > { %p354_p10 = scmp.lt.u32.totalorder %s352_s30, %s348_s27  ;;  %p356_p12 = scmp.lt.u32.totalorder %s348_s27, %s484_s19 }
 0x1f0   : > { %p350_p7 = pnand %p349_p4, %p458_p5 }
 0x1f1   : > { %p355_p11 = por %p354_p10, %p353_p9 }
 0x1f2   : > { %p351_p8 = pneg %p350_p7 }
 0x1f3   : > { %p357_p13 = por %p356_p12, %p355_p11 }
 0x1f5   : > { %p358_p0 = pnand %p357_p13, %p351_p8 }
 0x1f7   : > { %361 = shalt.err (!%p358_p0)
}
 0x1f8   : > { %290 = dma.vmem_to_hbm [thread:$0]  (%p458_p5), %s486_s10, 128, %s484_s19, %s208_s20  }
 0x1f9 PF: > { %p296_p1 = scmp.ge.s32.totalorder %s396_s15, 2  ;;  %s233_s6 = sand.u32 1, %s384_s12  }
 0x1fa   : > { %s234_s7 = scalar_lea.sflag [#allocation3], %s233_s6 }
 0x1fb   : > { %p293_p2 = pnand %p296_p1, %p462_p6 }
 0x1fd   : > { %379 = dma.done.wait (!%p293_p2), %s234_s7, 128  }
 0x1fe   : > { %381 = vsyncadd (!%p293_p2), %s234_s7, 4294967168  ;;  %p13_p3 = scmp.ge.s32.totalorder %s445_s18, 4   ;;  %s532_s12 = smov %s388_s13 }
 0x1ff   : > { %s533_s13 = smov %s392_s14  ;;  %s534_s14 = smov %s456_s21 }
 0x200   : > { %s535_s15 = smov %s445_s18  ;;  %15 = sbr.rel (!%p13_p3) target bundleno = 3 (0x3), region = 67 }
 0x207   :  { %239 = vsyncpa [#allocation3], 1 }
 0x208   :  { %241 = vsyncpa [#allocation3 + $0x1], 1 }

</bundles_post_ra>
